<compile_context>
chip_gen: v7x
topology: tpu7x:2x2x1
jax: 0.10.0
libtpu: 0.0.40
codegen_flags: <defaults>
</compile_context>

<pallas_src>
import functools

import jax
import jax.numpy as jnp
from jax.experimental import pallas as pl
from jax.experimental.pallas import tpu as pltpu


# ------------------------------ helpers ------------------------------------
def _round_up(x, m):
    return ((x + m - 1) // m) * m


# -------------- Pallas kernel 1: matmul + fused BN statistics ---------------
def _conv_mm_stats_kernel(a_ref, b_ref, y_ref, sum_ref, ssq_ref):
    # grid = (j over Cout tiles [parallel], i over row tiles [arbitrary/accum])
    i = pl.program_id(1)
    y = jnp.dot(a_ref[...], b_ref[...], preferred_element_type=jnp.float32)
    y_ref[...] = y

    @pl.when(i == 0)
    def _():
        sum_ref[...] = jnp.zeros_like(sum_ref)
        ssq_ref[...] = jnp.zeros_like(ssq_ref)

    # Padded rows of A are all-zero and the conv has no bias, so they contribute
    # exactly zero to both accumulators -> stats stay exact (divide by true M).
    sum_ref[...] += jnp.sum(y, axis=0, keepdims=True)
    ssq_ref[...] += jnp.sum(y * y, axis=0, keepdims=True)


def _conv_mm_stats(a_bf16, b_bf16, *, tm, tn):
    Mp, Kp = a_bf16.shape
    _, Np = b_bf16.shape
    grid = (Np // tn, Mp // tm)  # (j, i); i innermost so stats accumulate last-axis
    return pl.pallas_call(
        _conv_mm_stats_kernel,
        out_shape=(
            jax.ShapeDtypeStruct((Mp, Np), jnp.float32),
            jax.ShapeDtypeStruct((1, Np), jnp.float32),
            jax.ShapeDtypeStruct((1, Np), jnp.float32),
        ),
        grid_spec=pltpu.PrefetchScalarGridSpec(
            num_scalar_prefetch=0,
            grid=grid,
            in_specs=[
                pl.BlockSpec((tm, Kp), lambda j, i: (i, 0)),   # full-K block, no 128 pad
                pl.BlockSpec((Kp, tn), lambda j, i: (0, j)),
            ],
            out_specs=[
                pl.BlockSpec((tm, tn), lambda j, i: (i, j)),
                pl.BlockSpec((1, tn), lambda j, i: (0, j)),
                pl.BlockSpec((1, tn), lambda j, i: (0, j)),
            ],
        ),
        compiler_params=pltpu.CompilerParams(
            dimension_semantics=("parallel", "arbitrary")),
    )(a_bf16, b_bf16)


# -------------- Pallas kernel 2: BN affine + PReLU (elementwise) -------------
def _bn_prelu_kernel(x_ref, s_ref, t_ref, a_ref, o_ref):
    y = x_ref[...] * s_ref[...] + t_ref[...]
    o_ref[...] = jnp.where(y >= 0.0, y, a_ref[...] * y)


def _bn_prelu(y, scale_row, shift_row, alpha_row, *, tm, tn):
    Mp, Np = y.shape
    grid = (Mp // tm, Np // tn)
    return pl.pallas_call(
        _bn_prelu_kernel,
        out_shape=jax.ShapeDtypeStruct((Mp, Np), jnp.float32),
        grid_spec=pltpu.PrefetchScalarGridSpec(
            num_scalar_prefetch=0,
            grid=grid,
            in_specs=[
                pl.BlockSpec((tm, tn), lambda i, j: (i, j)),
                pl.BlockSpec((1, tn), lambda i, j: (0, j)),
                pl.BlockSpec((1, tn), lambda i, j: (0, j)),
                pl.BlockSpec((1, tn), lambda i, j: (0, j)),
            ],
            out_specs=pl.BlockSpec((tm, tn), lambda i, j: (i, j)),
        ),
        compiler_params=pltpu.CompilerParams(
            dimension_semantics=("parallel", "parallel")),
    )(y, scale_row, shift_row, alpha_row)


# ------------------------------ forward -------------------------------------
# TODO(synk): only the default configuration (norm_fn='bn' -> conv bias=False,
# act='prelu') is implemented; lrelu / no-norm variants are not wired up.
@functools.partial(jax.jit, static_argnames=("kernel_size", "stride", "dilation"))
def down_conv_block_fwd(params, x, *, kernel_size, stride, dilation=1, eps=1e-5):
    w = params["w"]                      # (Cout, Cin, kh, kw) — PyTorch layout
    gamma, beta, alpha = params["gamma"], params["beta"], params["alpha"]
    N, Cin, H, W = x.shape
    Cout = w.shape[0]
    kh = kw = kernel_size
    sh = sw = stride
    pad = (kernel_size - 1) // 2 * dilation

    # ReflectionPad2d (glue op, fused by XLA inside the whole-forward jit)
    xh = jnp.transpose(x, (0, 2, 3, 1))                      # NHWC
    xp = jnp.pad(xh, ((0, 0), (pad, pad), (pad, pad), (0, 0)), mode="reflect")
    Hp, Wp = xp.shape[1], xp.shape[2]
    Ho = (Hp - dilation * (kh - 1) - 1) // sh + 1
    Wo = (Wp - dilation * (kw - 1) - 1) // sw + 1

    # im2col -> rows (N*Ho*Wo, kh*kw*Cin); column order (tap, cin) matches w_mat
    cols = []
    for i in range(kh):
        for j in range(kw):
            di, dj = i * dilation, j * dilation
            cols.append(xp[:, di:di + sh * (Ho - 1) + 1:sh,
                            dj:dj + sw * (Wo - 1) + 1:sw, :])
    patches = jnp.stack(cols, axis=3)                        # (N,Ho,Wo,kh*kw,Cin)
    A = patches.reshape(N * Ho * Wo, kh * kw * Cin)
    Wm = jnp.transpose(w, (2, 3, 1, 0)).reshape(kh * kw * Cin, Cout)

    M, K = A.shape
    # Tile selection: big M tiles, full-K single block (K padded only to 16 for
    # bf16 sublane packing), Cout padded to a 128-lane multiple for dense stores.
    tm = min(_round_up(M, 16), 512)
    Mp = _round_up(M, tm)
    Kp = _round_up(K, 16)
    Np = _round_up(Cout, 128)
    tn = 256 if Np % 256 == 0 else 128

    # bf16 operands for the MXU; accumulation stays f32 inside the kernel.
    A_p = jnp.pad(A, ((0, Mp - M), (0, Kp - K))).astype(jnp.bfloat16)
    W_p = jnp.pad(Wm, ((0, Kp - K), (0, Np - Cout))).astype(jnp.bfloat16)

    y_p, csum, cssq = _conv_mm_stats(A_p, W_p, tm=tm, tn=tn)

    # BatchNorm2d training-mode statistics (biased variance) from fused sums.
    cnt = jnp.float32(M)
    mean = csum[0, :Cout] / cnt
    var = cssq[0, :Cout] / cnt - mean * mean
    scale = gamma * jax.lax.rsqrt(var + eps)
    shift = beta - mean * scale

    s_p = jnp.pad(scale, (0, Np - Cout)).reshape(1, Np)
    t_p = jnp.pad(shift, (0, Np - Cout)).reshape(1, Np)
    a_p = jnp.broadcast_to(jnp.asarray(alpha, jnp.float32).reshape(1, 1), (1, Np))

    out_p = _bn_prelu(y_p, s_p, t_p, a_p, tm=tm, tn=tn)
    out = out_p[:M, :Cout].reshape(N, Ho, Wo, Cout)
    return jnp.transpose(out, (0, 3, 1, 2))                  # back to NCHW


# ------------------------- pure-JAX reference (f32) --------------------------
def reference_fwd(params, x, kernel_size, stride, dilation=1, eps=1e-5):
    pad = (kernel_size - 1) // 2 * dilation
    xp = jnp.pad(x, ((0, 0), (0, 0), (pad, pad), (pad, pad)), mode="reflect")
    y = jax.lax.conv_general_dilated(
        xp, params["w"], window_strides=(stride, stride), padding="VALID",
        rhs_dilation=(dilation, dilation),
        dimension_numbers=("NCHW", "OIHW", "NCHW"))
    mean = jnp.mean(y, axis=(0, 2, 3), keepdims=True)
    var = jnp.mean((y - mean) ** 2, axis=(0, 2, 3), keepdims=True)
    yn = (y - mean) * jax.lax.rsqrt(var + eps)
    yn = yn * params["gamma"].reshape(1, -1, 1, 1) + params["beta"].reshape(1, -1, 1, 1)
    return jnp.where(yn >= 0.0, yn, params["alpha"] * yn)


# ---------------------------------- main -------------------------------------
if __name__ == "__main__":
    key = jax.random.PRNGKey(0)
    k_w, k_x = jax.random.split(key)

    in_ch, out_ch, ksz, stride = 4, 32, 3, 2
    params = {
        "w": jax.random.normal(k_w, (out_ch, in_ch, ksz, ksz), jnp.float32) * 0.05,
        "gamma": jnp.ones((out_ch,), jnp.float32),   # fresh BatchNorm2d init
        "beta": jnp.zeros((out_ch,), jnp.float32),
        "alpha": jnp.float32(0.25),                  # PReLU default init
    }
    x = jax.random.normal(k_x, (2, in_ch, 16, 16), jnp.float32)

    out = down_conv_block_fwd(params, x, kernel_size=ksz, stride=stride)
    out = jax.block_until_ready(out)

    assert out.shape == (2, out_ch, 8, 8), out.shape
    assert bool(jnp.all(jnp.isfinite(out)))

    ref = reference_fwd(params, x, ksz, stride)
    max_err = float(jnp.max(jnp.abs(out - ref)))
    assert max_err < 1e-1, f"max abs err {max_err}"

    print("KERNEL_OK")
</pallas_src>

<mosaic_0001>
module attributes {stable_mosaic.version = 11 : i64} {
  func.func @_conv_mm_stats_kernel(%arg0: i32, %arg1: i32, %arg2: memref<128x48xbf16, #tpu.memory_space<vmem>>, %arg3: memref<48x128xbf16, #tpu.memory_space<vmem>>, %arg4: memref<128x128xf32, #tpu.memory_space<vmem>>, %arg5: memref<1x128xf32, #tpu.memory_space<vmem>>, %arg6: memref<1x128xf32, #tpu.memory_space<vmem>>) attributes {dimension_semantics = [#tpu.dimension_semantics<parallel>, #tpu.dimension_semantics<arbitrary>], iteration_bounds = array<i64: 1, 1>, scalar_prefetch = 0 : i64, scratch_operands = 0 : i64, tpu.core_type = #tpu.core_type<tc>, window_params = [{transform_indices = @transform_0, window_bounds = array<i64: 128, 48>}, {transform_indices = @transform_1, window_bounds = array<i64: 48, 128>}, {transform_indices = @transform_2, window_bounds = array<i64: 128, 128>}, {transform_indices = @transform_3, window_bounds = array<i64: 1, 128>}, {transform_indices = @transform_4, window_bounds = array<i64: 1, 128>}]} {
    %c0 = arith.constant 0 : index
    %c0_0 = arith.constant 0 : index
    %0 = vector.load %arg2[%c0, %c0_0] : memref<128x48xbf16, #tpu.memory_space<vmem>>, vector<128x48xbf16>
    %c0_1 = arith.constant 0 : index
    %c0_2 = arith.constant 0 : index
    %1 = vector.load %arg3[%c0_1, %c0_2] : memref<48x128xbf16, #tpu.memory_space<vmem>>, vector<48x128xbf16>
    %cst = arith.constant dense<0.000000e+00> : vector<128x128xf32>
    %2 = tpu.matmul %0, %1, %cst {dimension_numbers = #tpu.dot_dimension_numbers<[1], [0], [0], [1], [0, 0, 1, 1], [], []>} : vector<128x48xbf16>, vector<48x128xbf16>, vector<128x128xf32> -> vector<128x128xf32>
    %c0_3 = arith.constant 0 : index
    %c0_4 = arith.constant 0 : index
    %3 = vector.load %arg4[%c0_3, %c0_4] : memref<128x128xf32, #tpu.memory_space<vmem>>, vector<128x128xf32>
    tpu.vector_store %arg4[%c0_3, %c0_4], %2 {strides = array<i32>} : memref<128x128xf32, #tpu.memory_space<vmem>>, vector<128x128xf32>,
    %c0_i32 = arith.constant 0 : i32
    %4 = arith.cmpi eq, %arg1, %c0_i32 : i32
    %5 = arith.extui %4 : i1 to i32
    %c0_i32_5 = arith.constant 0 : i32
    %6 = arith.cmpi ne, %5, %c0_i32_5 : i32
    scf.if %6 {
      %cst_16 = arith.constant 0.000000e+00 : f32
      %18 = vector.broadcast %cst_16 : f32 to vector<1x128xf32>
      %c0_17 = arith.constant 0 : index
      %c0_18 = arith.constant 0 : index
      %19 = vector.load %arg5[%c0_17, %c0_18] : memref<1x128xf32, #tpu.memory_space<vmem>>, vector<1x128xf32>
      tpu.vector_store %arg5[%c0_17, %c0_18], %18 {strides = array<i32>} : memref<1x128xf32, #tpu.memory_space<vmem>>, vector<1x128xf32>,
      %cst_19 = arith.constant 0.000000e+00 : f32
      %20 = vector.broadcast %cst_19 : f32 to vector<1x128xf32>
      %c0_20 = arith.constant 0 : index
      %c0_21 = arith.constant 0 : index
      %21 = vector.load %arg6[%c0_20, %c0_21] : memref<1x128xf32, #tpu.memory_space<vmem>>, vector<1x128xf32>
      tpu.vector_store %arg6[%c0_20, %c0_21], %20 {strides = array<i32>} : memref<1x128xf32, #tpu.memory_space<vmem>>, vector<1x128xf32>,
    } else {
    }
    %c0_6 = arith.constant 0 : index
    %c0_7 = arith.constant 0 : index
    %7 = vector.load %arg5[%c0_6, %c0_7] : memref<1x128xf32, #tpu.memory_space<vmem>>, vector<1x128xf32>
    %cst_8 = arith.constant dense<0.000000e+00> : vector<128xf32>
    %8 = vector.multi_reduction <add>, %2, %cst_8 [0] : vector<128x128xf32> to vector<128xf32>
    %9 = vector.shape_cast %8 : vector<128xf32> to vector<1x128xf32>
    %10 = arith.addf %7, %9 : vector<1x128xf32>
    %c0_9 = arith.constant 0 : index
    %c0_10 = arith.constant 0 : index
    %11 = vector.load %arg5[%c0_9, %c0_10] : memref<1x128xf32, #tpu.memory_space<vmem>>, vector<1x128xf32>
    tpu.vector_store %arg5[%c0_9, %c0_10], %10 {strides = array<i32>} : memref<1x128xf32, #tpu.memory_space<vmem>>, vector<1x128xf32>,
    %c0_11 = arith.constant 0 : index
    %c0_12 = arith.constant 0 : index
    %12 = vector.load %arg6[%c0_11, %c0_12] : memref<1x128xf32, #tpu.memory_space<vmem>>, vector<1x128xf32>
    %13 = arith.mulf %2, %2 : vector<128x128xf32>
    %cst_13 = arith.constant dense<0.000000e+00> : vector<128xf32>
    %14 = vector.multi_reduction <add>, %13, %cst_13 [0] : vector<128x128xf32> to vector<128xf32>
    %15 = vector.shape_cast %14 : vector<128xf32> to vector<1x128xf32>
    %16 = arith.addf %12, %15 : vector<1x128xf32>
    %c0_14 = arith.constant 0 : index
    %c0_15 = arith.constant 0 : index
    %17 = vector.load %arg6[%c0_14, %c0_15] : memref<1x128xf32, #tpu.memory_space<vmem>>, vector<1x128xf32>
    tpu.vector_store %arg6[%c0_14, %c0_15], %16 {strides = array<i32>} : memref<1x128xf32, #tpu.memory_space<vmem>>, vector<1x128xf32>,
    return
  }
  func.func @transform_0(%arg0: i32, %arg1: i32) -> (i32, i32) {
    %c0_i32 = arith.constant 0 : i32
    %c0_i32_0 = arith.constant 0 : i32
    return %arg1, %c0_i32 : i32, i32
  }
  func.func @transform_1(%arg0: i32, %arg1: i32) -> (i32, i32) {
    %c0_i32 = arith.constant 0 : i32
    %c0_i32_0 = arith.constant 0 : i32
    return %c0_i32, %arg0 : i32, i32
  }
  func.func @transform_2(%arg0: i32, %arg1: i32) -> (i32, i32) {
    %c0_i32 = arith.constant 0 : i32
    return %arg1, %arg0 : i32, i32
  }
  func.func @transform_3(%arg0: i32, %arg1: i32) -> (i32, i32) {
    %c0_i32 = arith.constant 0 : i32
    %c0_i32_0 = arith.constant 0 : i32
    return %c0_i32, %arg0 : i32, i32
  }
  func.func @transform_4(%arg0: i32, %arg1: i32) -> (i32, i32) {
    %c0_i32 = arith.constant 0 : i32
    %c0_i32_0 = arith.constant 0 : i32
    return %c0_i32, %arg0 : i32, i32
  }
}

module attributes {stable_mosaic.version = 11 : i64} {
  func.func @_bn_prelu_kernel(%arg0: i32, %arg1: i32, %arg2: memref<128x128xf32, #tpu.memory_space<vmem>>, %arg3: memref<1x128xf32, #tpu.memory_space<vmem>>, %arg4: memref<1x128xf32, #tpu.memory_space<vmem>>, %arg5: memref<1x128xf32, #tpu.memory_space<vmem>>, %arg6: memref<128x128xf32, #tpu.memory_space<vmem>>) attributes {dimension_semantics = [#tpu.dimension_semantics<parallel>, #tpu.dimension_semantics<parallel>], iteration_bounds = array<i64: 1, 1>, scalar_prefetch = 0 : i64, scratch_operands = 0 : i64, tpu.core_type = #tpu.core_type<tc>, window_params = [{transform_indices = @transform_0, window_bounds = array<i64: 128, 128>}, {transform_indices = @transform_1, window_bounds = array<i64: 1, 128>}, {transform_indices = @transform_2, window_bounds = array<i64: 1, 128>}, {transform_indices = @transform_3, window_bounds = array<i64: 1, 128>}, {transform_indices = @transform_4, window_bounds = array<i64: 128, 128>}]} {
    %c0 = arith.constant 0 : index
    %c0_0 = arith.constant 0 : index
    %0 = vector.load %arg2[%c0, %c0_0] : memref<128x128xf32, #tpu.memory_space<vmem>>, vector<128x128xf32>
    %c0_1 = arith.constant 0 : index
    %c0_2 = arith.constant 0 : index
    %1 = vector.load %arg3[%c0_1, %c0_2] : memref<1x128xf32, #tpu.memory_space<vmem>>, vector<1x128xf32>
    %2 = vector.broadcast %1 : vector<1x128xf32> to vector<128x128xf32>
    %3 = arith.mulf %0, %2 : vector<128x128xf32>
    %c0_3 = arith.constant 0 : index
    %c0_4 = arith.constant 0 : index
    %4 = vector.load %arg4[%c0_3, %c0_4] : memref<1x128xf32, #tpu.memory_space<vmem>>, vector<1x128xf32>
    %5 = vector.broadcast %4 : vector<1x128xf32> to vector<128x128xf32>
    %6 = arith.addf %3, %5 : vector<128x128xf32>
    %cst = arith.constant 0.000000e+00 : f32
    %7 = vector.broadcast %cst : f32 to vector<128x128xf32>
    %8 = arith.cmpf oge, %6, %7 : vector<128x128xf32>
    %c0_5 = arith.constant 0 : index
    %c0_6 = arith.constant 0 : index
    %9 = vector.load %arg5[%c0_5, %c0_6] : memref<1x128xf32, #tpu.memory_space<vmem>>, vector<1x128xf32>
    %10 = vector.broadcast %9 : vector<1x128xf32> to vector<128x128xf32>
    %11 = arith.mulf %10, %6 : vector<128x128xf32>
    %12 = arith.select %8, %6, %11 : vector<128x128xi1>, vector<128x128xf32>
    %c0_7 = arith.constant 0 : index
    %c0_8 = arith.constant 0 : index
    %13 = vector.load %arg6[%c0_7, %c0_8] : memref<128x128xf32, #tpu.memory_space<vmem>>, vector<128x128xf32>
    tpu.vector_store %arg6[%c0_7, %c0_8], %12 {strides = array<i32>} : memref<128x128xf32, #tpu.memory_space<vmem>>, vector<128x128xf32>,
    return
  }
  func.func @transform_0(%arg0: i32, %arg1: i32) -> (i32, i32) {
    %c0_i32 = arith.constant 0 : i32
    return %arg0, %arg1 : i32, i32
  }
  func.func @transform_1(%arg0: i32, %arg1: i32) -> (i32, i32) {
    %c0_i32 = arith.constant 0 : i32
    %c0_i32_0 = arith.constant 0 : i32
    return %c0_i32, %arg1 : i32, i32
  }
  func.func @transform_2(%arg0: i32, %arg1: i32) -> (i32, i32) {
    %c0_i32 = arith.constant 0 : i32
    %c0_i32_0 = arith.constant 0 : i32
    return %c0_i32, %arg1 : i32, i32
  }
  func.func @transform_3(%arg0: i32, %arg1: i32) -> (i32, i32) {
    %c0_i32 = arith.constant 0 : i32
    %c0_i32_0 = arith.constant 0 : i32
    return %c0_i32, %arg1 : i32, i32
  }
  func.func @transform_4(%arg0: i32, %arg1: i32) -> (i32, i32) {
    %c0_i32 = arith.constant 0 : i32
    return %arg0, %arg1 : i32, i32
  }
}

</mosaic_0001>

<bundles_post_ra>
// kernel: down_conv_block_fwd.3
= control target key start
LH: loop header
LB: loop body
LE: loop exit
PB: predicated region body
PF: predicated region fallthrough
CT: control target
= control target key end

     0   :  { %s348_s0 = inlined_call_operand.vmem [shape: f32[128,128], index: 0, kind: input, shape index: {}]   ;;  %s349_s1 = inlined_call_operand.vmem [shape: f32[1,128], index: 1, kind: input, shape index: {}]   ;;  %s350_s2 = inlined_call_operand.vmem [shape: f32[1,128], index: 2, kind: input, shape index: {}]   ;;  %s351_s3 = inlined_call_operand.vmem [shape: f32[1,128], index: 3, kind: input, shape index: {}]   ;;  %s352_s4 = inlined_call_operand.hbm [shape: f32[128,128], index: 4, kind: output, shape index: {}]  }
   0x1   :  { %v18_v0 = vld [vmem:[%s348_s0] sm:$0xff]  ;;  %v19_v5 = vld [vmem:[%s348_s0 + $0x8] sm:$0xff]  ;;  %v20_v6 = vld [vmem:[%s348_s0 + $0x10] sm:$0xff] }
   0x2   :  { %v231_v1 = vld [vmem:[%s349_s1] ss:$0 sm:$0xff]  ;;  %v21_v9 = vld [vmem:[%s348_s0 + $0x18] sm:$0xff]  ;;  %v23_v11 = vld [vmem:[%s348_s0 + $0x28] sm:$0xff] }
   0x3   :  { %v236_v2 = vld [vmem:[%s350_s2] ss:$0 sm:$0xff]  ;;  %v41_v3 = vmul.f32 %v231_v1, %v18_v0  ;;  %v42_v7 = vmul.f32 %v231_v1, %v19_v5  ;;  %v43_v8 = vmul.f32 %v231_v1, %v20_v6  ;;  %v44_v13 = vmul.f32 %v231_v1, %v21_v9  ;;  %v24_v16 = vld [vmem:[%s348_s0 + $0x30] sm:$0xff]  ;;  %v25_v17 = vld [vmem:[%s348_s0 + $0x38] sm:$0xff] }
   0x4   :  { %v242_v4 = vld [vmem:[%s351_s3] ss:$0 sm:$0xff]  ;;  %v46_v15 = vmul.f32 %v231_v1, %v23_v11  ;;  %v47_v20 = vmul.f32 %v231_v1, %v24_v16  ;;  %v48_v21 = vmul.f32 %v231_v1, %v25_v17 }
   0x5   :  { %v22_v10 = vld [vmem:[%s348_s0 + $0x20] sm:$0xff]  ;;  %v64_v12 = vadd.f32 %v236_v2, %v41_v3  ;;  %v65_v18 = vadd.f32 %v236_v2, %v42_v7  ;;  %v66_v19 = vadd.f32 %v236_v2, %v43_v8  ;;  %v67_v23 = vadd.f32 %v236_v2, %v44_v13 }
   0x6   :  { %v45_v14 = vmul.f32 %v231_v1, %v22_v10  ;;  %v26_v27 = vld [vmem:[%s348_s0 + $0x40] sm:$0xff] }
   0x7   :  { %vm80_vm0 = vcmp.ge.f32.partialorder %v64_v12, 0.0  ;;  %v103_v22 = vmul.f32 %v242_v4, %v64_v12  ;;  %vm81_vm1 = vcmp.ge.f32.partialorder %v65_v18, 0.0  ;;  %v104_v25 = vmul.f32 %v242_v4, %v65_v18 }
   0x8   :  { %v68_v24 = vadd.f32 %v236_v2, %v45_v14  ;;  %vm82_vm2 = vcmp.ge.f32.partialorder %v66_v19, 0.0  ;;  %v105_v26 = vmul.f32 %v242_v4, %v66_v19 }
   0x9   :  { %9 = vsyncpa [#allocation3], 0  ;;  %v119_v28 = vsel %vm80_vm0, %v64_v12, %v103_v22  ;;  %vm83_vm3 = vcmp.ge.f32.partialorder %v67_v23, 0.0  ;;  %v106_v29 = vmul.f32 %v242_v4, %v67_v23  ;;  %v27_v30 = vld [vmem:[%s348_s0 + $0x48] sm:$0xff]  ;;  %v120_v31 = vsel %vm81_vm1, %v65_v18, %v104_v25  ;;  %v28_v39 = vld [vmem:[%s348_s0 + $0x50] sm:$0xff] }
   0xa   :  { %vm84_vm4 = vcmp.ge.f32.partialorder %v68_v24, 0.0  ;;  %135 = vst [vmem:[#allocation2] sm:$0xff] %v119_v28  ;;  %v121_v32 = vsel %vm82_vm2, %v66_v19, %v105_v26  ;;  %v107_v33 = vmul.f32 %v242_v4, %v68_v24  ;;  %v69_v34 = vadd.f32 %v236_v2, %v46_v15  ;;  %136 = vst [vmem:[#allocation2 + $0x8] sm:$0xff] %v120_v31  ;;  %v29_v43 = vld [vmem:[%s348_s0 + $0x58] sm:$0xff]  ;;  %v30_v44 = vld [vmem:[%s348_s0 + $0x60] sm:$0xff] }
   0xb   :  { %137 = vst [vmem:[#allocation2 + $0x10] sm:$0xff] %v121_v32  ;;  %v122_v35 = vsel %vm83_vm3, %v67_v23, %v106_v29  ;;  %v70_v36 = vadd.f32 %v236_v2, %v47_v20  ;;  %v71_v37 = vadd.f32 %v236_v2, %v48_v21  ;;  %v49_v38 = vmul.f32 %v231_v1, %v26_v27  ;;  %v31_v51 = vld [vmem:[%s348_s0 + $0x68] sm:$0xff]  ;;  %v32_v56 = vld [vmem:[%s348_s0 + $0x70] sm:$0xff]  ;;  %v33_v57 = vld [vmem:[%s348_s0 + $0x78] sm:$0xff]  ;;  %s197_s0 = smov [#allocation2]  }
   0xc   :  { %138 = vst [vmem:[#allocation2 + $0x18] sm:$0xff] %v122_v35  ;;  %v123_v40 = vsel %vm84_vm4, %v68_v24, %v107_v33  ;;  %vm85_vm5 = vcmp.ge.f32.partialorder %v69_v34, 0.0  ;;  %v108_v41 = vmul.f32 %v242_v4, %v69_v34  ;;  %v50_v42 = vmul.f32 %v231_v1, %v27_v30  ;;  %s156_s24 = sshll.u32 %s197_s0, 4  ;;  %s157_s24 = int_to_ptr.vmem [resolvable:$true] %s156_s24 }
   0xd   :  { %139 = vst [vmem:[#allocation2 + $0x20] sm:$0xff] %v123_v40  ;;  %vm86_vm6 = vcmp.ge.f32.partialorder %v70_v36, 0.0  ;;  %v109_v45 = vmul.f32 %v242_v4, %v70_v36  ;;  %vm87_vm7 = vcmp.ge.f32.partialorder %v71_v37, 0.0  ;;  %v110_v46 = vmul.f32 %v242_v4, %v71_v37  ;;  %s173_s25 = scalar_lea.vmem %s157_s24, 2048  ;;  %p178_p1 = scmp.lt.s32.totalorder %s157_s24, %s157_s24 }
   0xe   :  { %v124_v47 = vsel %vm85_vm5, %v69_v34, %v108_v41  ;;  %v72_v48 = vadd.f32 %v236_v2, %v49_v38  ;;  %v73_v49 = vadd.f32 %v236_v2, %v50_v42  ;;  %v51_v50 = vmul.f32 %v231_v1, %v28_v39  ;;  %p174_p0 = scmp.ne.s32.totalorder %s157_s24, %s173_s25  ;;  %p179_p2 = scmp.lt.s32.totalorder %s173_s25, %s173_s25 }
   0xf   :  { %140 = vst [vmem:[#allocation2 + $0x28] sm:$0xff] %v124_v47  ;;  %v125_v52 = vsel %vm86_vm6, %v70_v36, %v109_v45  ;;  %v126_v53 = vsel %vm87_vm7, %v71_v37, %v110_v46  ;;  %v52_v54 = vmul.f32 %v231_v1, %v29_v43  ;;  %v53_v55 = vmul.f32 %v231_v1, %v30_v44 }
  0x10   :  { %141 = vst [vmem:[#allocation2 + $0x30] sm:$0xff] %v125_v52  ;;  %142 = vst [vmem:[#allocation2 + $0x38] sm:$0xff] %v126_v53  ;;  %vm88_vm8 = vcmp.ge.f32.partialorder %v72_v48, 0.0  ;;  %v111_v58 = vmul.f32 %v242_v4, %v72_v48  ;;  %vm89_vm9 = vcmp.ge.f32.partialorder %v73_v49, 0.0  ;;  %v112_v59 = vmul.f32 %v242_v4, %v73_v49  ;;  %p180_p3 = por %p179_p2, %p178_p1 }
  0x11   :  { %v74_v60 = vadd.f32 %v236_v2, %v51_v50  ;;  %v75_v61 = vadd.f32 %v236_v2, %v52_v54  ;;  %v76_v62 = vadd.f32 %v236_v2, %v53_v55  ;;  %v54_v63 = vmul.f32 %v231_v1, %v31_v51 }
  0x12   :  { %v127_v0 = vsel %vm88_vm8, %v72_v48, %v111_v58  ;;  %v128_v3 = vsel %vm89_vm9, %v73_v49, %v112_v59  ;;  %v55_v5 = vmul.f32 %v231_v1, %v32_v56  ;;  %v56_v6 = vmul.f32 %v231_v1, %v33_v57  ;;  %p181_p4 = pnand %p180_p3, %p174_p0 }
  0x13   :  { %143 = vst [vmem:[#allocation2 + $0x40] sm:$0xff] %v127_v0  ;;  %144 = vst [vmem:[#allocation2 + $0x48] sm:$0xff] %v128_v3  ;;  %vm90_vm10 = vcmp.ge.f32.partialorder %v74_v60, 0.0  ;;  %v113_v7 = vmul.f32 %v242_v4, %v74_v60  ;;  %vm91_vm11 = vcmp.ge.f32.partialorder %v75_v61, 0.0  ;;  %v114_v8 = vmul.f32 %v242_v4, %v75_v61 }
  0x14   :  { %vm92_vm12 = vcmp.ge.f32.partialorder %v76_v62, 0.0  ;;  %v115_v9 = vmul.f32 %v242_v4, %v76_v62  ;;  %v77_v10 = vadd.f32 %v236_v2, %v54_v63  ;;  %v78_v11 = vadd.f32 %v236_v2, %v55_v5 }
  0x15   :  { %v129_v12 = vsel %vm90_vm10, %v74_v60, %v113_v7  ;;  %v130_v13 = vsel %vm91_vm11, %v75_v61, %v114_v8  ;;  %v79_v14 = vadd.f32 %v236_v2, %v56_v6 }
  0x16   :  { %145 = vst [vmem:[#allocation2 + $0x50] sm:$0xff] %v129_v12  ;;  %146 = vst [vmem:[#allocation2 + $0x58] sm:$0xff] %v130_v13  ;;  %v131_v1 = vsel %vm92_vm12, %v76_v62, %v115_v9  ;;  %vm93_vm13 = vcmp.ge.f32.partialorder %v77_v10, 0.0  ;;  %v116_v15 = vmul.f32 %v242_v4, %v77_v10  ;;  %vm94_vm14 = vcmp.ge.f32.partialorder %v78_v11, 0.0 }
  0x17   :  { %147 = vst [vmem:[#allocation2 + $0x60] sm:$0xff] %v131_v1  ;;  %v117_v16 = vmul.f32 %v242_v4, %v78_v11  ;;  %vm95_vm15 = vcmp.ge.f32.partialorder %v79_v14, 0.0  ;;  %v118_v17 = vmul.f32 %v242_v4, %v79_v14 }
  0x18   :  { %v132_v18 = vsel %vm93_vm13, %v77_v10, %v116_v15 }
  0x19   :  { %148 = vst [vmem:[#allocation2 + $0x68] sm:$0xff] %v132_v18  ;;  %v133_v19 = vsel %vm94_vm14, %v78_v11, %v117_v16  ;;  %v134_v2 = vsel %vm95_vm15, %v79_v14, %v118_v17 }
  0x1a   :  { %149 = vst [vmem:[#allocation2 + $0x70] sm:$0xff] %v133_v19  ;;  %150 = vst [vmem:[#allocation2 + $0x78] sm:$0xff] %v134_v2 }
  0x1b   :  { %184 = shalt.err (!%p181_p4)
}
  0x1c   :  { %s185_s2 = scalar_lea.hbm %s352_s4, 2048 }
  0x1d   :  { %p186_p5 = scmp.ne.s32.totalorder %s352_s4, %s185_s2  ;;  %p189_p6 = scmp.lt.u32.totalorder %s185_s2, %s352_s4 }
  0x1f   :  { %p191_p7 = pnand %p189_p6, %p186_p5 }
  0x21   :  { %194 = shalt.err (!%p191_p7)
}
  0x22   :  { %s198_s30 = smov 128   ;;  %s199_s5 = smov 8  }
  0x23   :  { %162 = dma.vmem_to_hbm [thread:$0]  %s157_s24, 2048, %s352_s4, [#allocation3], %s198_s30, %s198_s30, %s199_s5  }
  0x24   :  { %195 = dma.done.wait [#allocation3], 2048  }
  0x25   :  { %196 = vsyncadd [#allocation3], 4294965248 }
  0x26   :  { %166 = vsyncpa [#allocation3], 1 }

// kernel: down_conv_block_fwd.2
= control target key start
LH: loop header
LB: loop body
LE: loop exit
PB: predicated region body
PF: predicated region fallthrough
CT: control target
= control target key end

     0   :  { %vm95_vm0 = vcmask 392192   ;;  %v385_v11 = vmov 0.0   ;;  %s518_s1 = inlined_call_operand.vmem [shape: bf16[48,128], index: 1, kind: input, shape index: {}]   ;;  %s519_s0 = inlined_call_operand.vmem [shape: bf16[128,48], index: 0, kind: input, shape index: {}]   ;;  %s520_s3 = inlined_call_operand.vmem [shape: f32[1,128], index: 3, kind: output, shape index: {1}]   ;;  %s521_s4 = inlined_call_operand.vmem [shape: f32[1,128], index: 4, kind: output, shape index: {2}]   ;;  %s522_s2 = inlined_call_operand.vmem [shape: f32[128,128], index: 2, kind: output, shape index: {0}]  }
   0x1   :  { %v374_v0 = vld [vmem:[%s518_s1] sm:$0xff]   ;;  %v375_v1 = vld [vmem:[%s518_s1 + $0x8] sm:$0xff]   ;;  %v376_v3 = vld [vmem:[%s518_s1 + $0x10] sm:$0xff]   ;;  %237 = vst [vmem:[%s520_s3] sm:$0x1] %v385_v11 }
   0x2   :  { %345 = vmatprep.subr.bf16.mxu0 %v374_v0  ;;  %367 = vmatprep.subr.bf16.mxu1 %v374_v0  ;;  %v377_v2 = vld [vmem:[%s519_s0] sm:$0xff]   ;;  %v378_v5 = vld [vmem:[%s519_s0 + $0x8] sm:$0xff]   ;;  %v379_v7 = vld [vmem:[%s519_s0 + $0x10] sm:$0xff]   ;;  %238 = vst [vmem:[%s521_s4] sm:$0x1] %v385_v11 }
   0x3   :  { %346 = vmatpush3.bf16.msra.mxu0 %v374_v0  ;;  %370 = vmatpush3.bf16.msra.mxu1 %v374_v0  ;;  %v381_v4 = vld [vmem:[%s519_s0 + $0x20] sm:$0xff]   ;;  %v382_v6 = vld [vmem:[%s519_s0 + $0x28] sm:$0xff]   ;;  %v383_v8 = vld [vmem:[%s519_s0 + $0x30] sm:$0xff]  }
   0x4   :  { %347 = vmatprep.subr.bf16.mxu0 %v375_v1  ;;  %368 = vmatprep.subr.bf16.mxu1 %v375_v1  ;;  %v380_v9 = vld [vmem:[%s519_s0 + $0x18] sm:$0xff]  }
   0x5   :  { %351 = vmatprep.mubr.msk.bf16.mxu0 %vm95_vm0, %v377_v2  ;;  %359 = vmatprep.mubr.msk.bf16.mxu1 %vm95_vm0, %v381_v4  ;;  %v384_v10 = vld [vmem:[%s519_s0 + $0x38] sm:$0xff]  }
   0x7   :  { %348 = vmatpush3.bf16.msra.mxu0 %v375_v1  ;;  %371 = vmatpush3.bf16.msra.mxu1 %v375_v1 }
   0x8   :  { %349 = vmatprep.subr.bf16.mxu0 %v376_v3  ;;  %369 = vmatprep.subr.bf16.mxu1 %v376_v3 }
   0xb   :  { %350 = vmatpush3.bf16.msra.mxu0 %v376_v3  ;;  %372 = vmatpush3.bf16.msra.mxu1 %v376_v3 }
   0xe   :  { %352 = vmatmul.mubr.msk.bf16.vlgmr.msra.gmra.mrb[0].mxu0 %vm95_vm0, %v378_v5  ;;  %360 = vmatmul.mubr.msk.bf16.vlgmr.msra.gmra.mrb[0].mxu1 %vm95_vm0, %v382_v6 }
   0xf   :  { %355 = vmatprep.mubr.msk.bf16.mxu0 %vm95_vm0, %v379_v7  ;;  %363 = vmatprep.mubr.msk.bf16.mxu1 %vm95_vm0, %v383_v8 }
  0x16   :  { %356 = vmatmul.mubr.msk.bf16.gmra.mrb[4].mxu0 %vm95_vm0, %v380_v9  ;;  %364 = vmatmul.mubr.msk.bf16.gmra.mrb[4].mxu1 %vm95_vm0, %v384_v10 }
  0xe1   :  { %v353_v12 = vpop.f32.mrb[0].mxu0  ;;  %v361_v13 = vpop.f32.mrb[0].mxu1 }
  0xe2   :  { %219 = vst [vmem:[%s522_s2 + $0x10] sm:$0xff] %v353_v12  ;;  %v154_v14 = vpop.f32.mrb[1].mxu0  ;;  %227 = vst [vmem:[%s522_s2 + $0x50] sm:$0xff] %v361_v13  ;;  %v186_v15 = vpop.f32.mrb[1].mxu1  ;;  %v266_v23 = vmul.f32 %v353_v12, %v353_v12  ;;  %v274_v55 = vmul.f32 %v361_v13, %v361_v13 }
  0xe3   :  { %217 = vst [vmem:[%s522_s2] sm:$0xff] %v154_v14  ;;  %v354_v16 = vpop.f32.mrb[2].mxu0  ;;  %225 = vst [vmem:[%s522_s2 + $0x40] sm:$0xff] %v186_v15  ;;  %v362_v17 = vpop.f32.mrb[2].mxu1  ;;  %v264_v20 = vmul.f32 %v154_v14, %v154_v14  ;;  %v272_v49 = vmul.f32 %v186_v15, %v186_v15 }
  0xe4   :  { %220 = vst [vmem:[%s522_s2 + $0x18] sm:$0xff] %v354_v16  ;;  %v157_v18 = vpop.f32.mrb[3].mxu0  ;;  %228 = vst [vmem:[%s522_s2 + $0x58] sm:$0xff] %v362_v17  ;;  %v189_v19 = vpop.f32.mrb[3].mxu1  ;;  %v267_v26 = vmul.f32 %v354_v16, %v354_v16  ;;  %v275_v58 = vmul.f32 %v362_v17, %v362_v17 }
  0xe5   :  { %218 = vst [vmem:[%s522_s2 + $0x8] sm:$0xff] %v157_v18  ;;  %v240_v21 = vadd.f32 %v157_v18, %v154_v14  ;;  %v265_v22 = vmul.f32 %v157_v18, %v157_v18  ;;  %226 = vst [vmem:[%s522_s2 + $0x48] sm:$0xff] %v189_v19  ;;  %v273_v54 = vmul.f32 %v189_v19, %v189_v19 }
  0xe7   :  { %v241_v24 = vadd.f32 %v353_v12, %v240_v21  ;;  %v280_v25 = vadd.f32 %v265_v22, %v264_v20  ;;  %v263_v22 = vld [vmem:[%s521_s4] sm:$0x1] }
  0xe9   :  { %v281_v27 = vadd.f32 %v280_v25, %v266_v23  ;;  %v357_v28 = vpop.f32.mrb[4].mxu0  ;;  %v242_v29 = vadd.f32 %v354_v16, %v241_v24  ;;  %v365_v30 = vpop.f32.mrb[4].mxu1 }
  0xea   :  { %223 = vst [vmem:[%s522_s2 + $0x30] sm:$0xff] %v357_v28  ;;  %v170_v31 = vpop.f32.mrb[5].mxu0  ;;  %231 = vst [vmem:[%s522_s2 + $0x70] sm:$0xff] %v365_v30  ;;  %v202_v32 = vpop.f32.mrb[5].mxu1  ;;  %v270_v43 = vmul.f32 %v357_v28, %v357_v28  ;;  %v278_v3 = vmul.f32 %v365_v30, %v365_v30 }
  0xeb   :  { %221 = vst [vmem:[%s522_s2 + $0x20] sm:$0xff] %v170_v31  ;;  %v243_v33 = vadd.f32 %v242_v29, %v170_v31  ;;  %v268_v34 = vmul.f32 %v170_v31, %v170_v31  ;;  %v282_v35 = vadd.f32 %v281_v27, %v267_v26  ;;  %v358_v36 = vpop.f32.mrb[6].mxu0  ;;  %229 = vst [vmem:[%s522_s2 + $0x60] sm:$0xff] %v202_v32  ;;  %v366_v37 = vpop.f32.mrb[6].mxu1 }
  0xec   :  { %224 = vst [vmem:[%s522_s2 + $0x38] sm:$0xff] %v358_v36  ;;  %v173_v38 = vpop.f32.mrb[7].mxu0  ;;  %232 = vst [vmem:[%s522_s2 + $0x78] sm:$0xff] %v366_v37  ;;  %v205_v39 = vpop.f32.mrb[7].mxu1  ;;  %v271_v46 = vmul.f32 %v358_v36, %v358_v36  ;;  %v276_v61 = vmul.f32 %v202_v32, %v202_v32  ;;  %v279_v6 = vmul.f32 %v366_v37, %v366_v37 }
  0xed   :  { %v283_v40 = vadd.f32 %v282_v35, %v268_v34  ;;  %222 = vst [vmem:[%s522_s2 + $0x28] sm:$0xff] %v173_v38  ;;  %v244_v41 = vadd.f32 %v243_v33, %v173_v38  ;;  %v269_v42 = vmul.f32 %v173_v38, %v173_v38  ;;  %230 = vst [vmem:[%s522_s2 + $0x68] sm:$0xff] %v205_v39 }
  0xee   :  { %v277_v2 = vmul.f32 %v205_v39, %v205_v39 }
  0xef   :  { %v245_v44 = vadd.f32 %v357_v28, %v244_v41  ;;  %v284_v45 = vadd.f32 %v283_v40, %v269_v42 }
  0xf1   :  { %v285_v47 = vadd.f32 %v284_v45, %v270_v43  ;;  %v246_v48 = vadd.f32 %v358_v36, %v245_v44 }
  0xf3   :  { %v247_v50 = vadd.f32 %v246_v48, %v186_v15  ;;  %v286_v51 = vadd.f32 %v285_v47, %v271_v46 }
  0xf5   :  { %v287_v52 = vadd.f32 %v286_v51, %v272_v49  ;;  %v248_v53 = vadd.f32 %v247_v50, %v189_v19  ;;  %v239_v19 = vld [vmem:[%s520_s3] sm:$0x1] }
  0xf7   :  { %v249_v56 = vadd.f32 %v361_v13, %v248_v53  ;;  %v288_v57 = vadd.f32 %v287_v52, %v273_v54 }
  0xf9   :  { %v289_v59 = vadd.f32 %v288_v57, %v274_v55  ;;  %v250_v60 = vadd.f32 %v362_v17, %v249_v56 }
  0xfb   :  { %v251_v62 = vadd.f32 %v250_v60, %v202_v32  ;;  %v290_v63 = vadd.f32 %v289_v59, %v275_v58 }
  0xfd   :  { %v291_v0 = vadd.f32 %v290_v63, %v276_v61  ;;  %v252_v1 = vadd.f32 %v251_v62, %v205_v39 }
  0xff   :  { %v253_v4 = vadd.f32 %v365_v30, %v252_v1  ;;  %v292_v5 = vadd.f32 %v291_v0, %v277_v2 }
 0x101   :  { %v254_v7 = vadd.f32 %v366_v37, %v253_v4  ;;  %v293_v8 = vadd.f32 %v292_v5, %v278_v3 }
 0x103   :  { %v255_v9 = vrot.slane %v254_v7, 4  ;;  %v294_v10 = vadd.f32 %v293_v8, %v279_v6 }
 0x105   :  { %v256_v11 = vadd.f32 %v255_v9, %v254_v7  ;;  %v295_v12 = vrot.slane %v294_v10, 4 }
 0x107   :  { %v257_v13 = vrot.slane %v256_v11, 2  ;;  %v296_v14 = vadd.f32 %v295_v12, %v294_v10 }
 0x109   :  { %v258_v15 = vadd.f32 %v257_v13, %v256_v11  ;;  %v297_v16 = vrot.slane %v296_v14, 2 }
 0x10b   :  { %v259_v17 = vrot.slane %v258_v15, 1  ;;  %v298_v18 = vadd.f32 %v297_v16, %v296_v14 }
 0x10d   :  { %v260_v20 = vadd.f32 %v259_v17, %v258_v15  ;;  %v299_v21 = vrot.slane %v298_v18, 1 }
 0x10f   :  { %v261_v23 = vadd.f32 %v260_v20, %v239_v19  ;;  %v300_v24 = vadd.f32 %v299_v21, %v298_v18 }
 0x111   :  { %262 = vst [vmem:[%s520_s3] sm:$0x1] %v261_v23  ;;  %v301_v25 = vadd.f32 %v300_v24, %v263_v22 }
 0x113   :  { %302 = vst [vmem:[%s521_s4] sm:$0x1] %v301_v25 }

</bundles_post_ra>
